<compile_context>
chip_gen: v7x
topology: tpu7x:2x2x1
jax: 0.10.0
libtpu: 0.0.40
codegen_flags: <defaults>
</compile_context>

<pallas_src>
import functools

import jax
import jax.numpy as jnp
from jax.experimental import pallas as pl
from jax.experimental.pallas import tpu as pltpu


def _round_up(a, b):
    return (a + b - 1) // b * b


# --------------------------------------------------------------- kernels ----

def proj_kernel(x_ref, w_ref, o_ref):
    """o = x @ w for one row tile of x (full w resident)."""
    o_ref[...] = jnp.dot(x_ref[...], w_ref[...],
                         preferred_element_type=jnp.float32).astype(o_ref.dtype)


def layer1_kernel(a_ref, xw_ref, b1_ref, w2_ref, m_ref):
    """m = (A_tile @ XW1 + b1) @ W2 for one row tile of A."""
    h1 = jnp.dot(a_ref[...], xw_ref[...],
                 preferred_element_type=jnp.float32) + b1_ref[...]
    m_ref[...] = jnp.dot(h1.astype(jnp.bfloat16), w2_ref[...],
                         preferred_element_type=jnp.float32).astype(m_ref.dtype)


def layer2_softmax_kernel(a_ref, m_ref, b2_ref, o_ref, *, nclass):
    """o = softmax(A_tile @ M + b2) over the first `nclass` (real) lanes."""
    h2 = jnp.dot(a_ref[...], m_ref[...],
                 preferred_element_type=jnp.float32) + b2_ref[...]
    # Mask the zero-padded class lanes so max/sum only see real classes.
    cls = jax.lax.broadcasted_iota(jnp.int32, h2.shape, 1)
    h2 = jnp.where(cls < nclass, h2, -jnp.inf)
    z = h2 - jnp.max(h2, axis=-1, keepdims=True)
    e = jnp.exp(z)                                  # exp -> EUP slot
    denom = jnp.sum(e, axis=-1, keepdims=True)
    r = pl.reciprocal(denom, approx=True)           # divide off the VALU path
    r = r * (2.0 - denom * r)                       # one Newton step -> ~f32 exact
    o_ref[...] = e * r                              # lane-dense (128-wide) store


# --------------------------------------------------------------- wrapper ----

def _compiler_params(tiled_bytes, resident_bytes):
    # double-buffered tiled blocks + resident full blocks, 2x slack,
    # floor 8 MiB, cap 64 MiB (v7x physical VMEM per TensorCore).
    limit = 2 * tiled_bytes + resident_bytes
    limit = int(min(max(2 * limit, 8 << 20), 64 << 20))
    return pltpu.CompilerParams(
        dimension_semantics=("parallel",),
        vmem_limit_bytes=limit,
    )


def gcn_forward(x, a_norm, w1, b1, w2, b2, *, tile_m=256):
    n, nfeat = x.shape
    hdim, nclass = w2.shape

    tm = tile_m if n >= tile_m else _round_up(n, 8)
    n_pad = _round_up(n, tm)
    f_pad = _round_up(nfeat, 128)
    h_pad = _round_up(hdim, 128)
    c_pad = _round_up(nclass, 128)
    grid = (n_pad // tm,)

    bf = jnp.bfloat16
    # Zero-padded, bf16 operands (f32 accumulation happens inside the kernels).
    a_p = jnp.zeros((n_pad, n_pad), bf).at[:n, :n].set(a_norm.astype(bf))
    x_p = jnp.zeros((n_pad, f_pad), bf).at[:n, :nfeat].set(x.astype(bf))
    w1_p = jnp.zeros((f_pad, h_pad), bf).at[:nfeat, :hdim].set(w1.astype(bf))
    w2_p = jnp.zeros((h_pad, c_pad), bf).at[:hdim, :nclass].set(w2.astype(bf))
    b1_p = jnp.zeros((1, h_pad), jnp.float32).at[:, :hdim].set(
        b1.reshape(1, -1).astype(jnp.float32))
    b2_p = jnp.zeros((1, c_pad), jnp.float32).at[:, :nclass].set(
        b2.reshape(1, -1).astype(jnp.float32))

    row_tile = lambda i: (i, 0)   # block index map: i-th row tile
    whole = lambda i: (0, 0)      # full-array resident block

    # ---- K0: XW1 = X @ W1 (hoisted out of the A-tile loops) -----------------
    xw1 = pl.pallas_call(
        proj_kernel,
        out_shape=jax.ShapeDtypeStruct((n_pad, h_pad), bf),
        grid=grid,
        in_specs=[pl.BlockSpec((tm, f_pad), row_tile),
                  pl.BlockSpec((f_pad, h_pad), whole)],
        out_specs=pl.BlockSpec((tm, h_pad), row_tile),
        compiler_params=_compiler_params(
            tiled_bytes=tm * f_pad * 2 + tm * h_pad * 2,
            resident_bytes=f_pad * h_pad * 2),
        cost_estimate=pl.CostEstimate(
            flops=2 * n_pad * f_pad * h_pad,
            transcendentals=0,
            bytes_accessed=(n_pad * f_pad + f_pad * h_pad + n_pad * h_pad) * 2),
    )(x_p, w1_p)

    # ---- K1: M = (A @ XW1 + b1) @ W2 ----------------------------------------
    m = pl.pallas_call(
        layer1_kernel,
        out_shape=jax.ShapeDtypeStruct((n_pad, c_pad), bf),
        grid=grid,
        in_specs=[pl.BlockSpec((tm, n_pad), row_tile),
                  pl.BlockSpec((n_pad, h_pad), whole),
                  pl.BlockSpec((1, h_pad), whole),
                  pl.BlockSpec((h_pad, c_pad), whole)],
        out_specs=pl.BlockSpec((tm, c_pad), row_tile),
        compiler_params=_compiler_params(
            tiled_bytes=tm * n_pad * 2 + tm * c_pad * 2,
            resident_bytes=n_pad * h_pad * 2 + h_pad * 4 + h_pad * c_pad * 2),
        cost_estimate=pl.CostEstimate(
            flops=2 * n_pad * n_pad * h_pad + 2 * n_pad * h_pad * c_pad,
            transcendentals=0,
            bytes_accessed=(n_pad * n_pad + n_pad * h_pad
                            + h_pad * c_pad + n_pad * c_pad) * 2),
    )(a_p, xw1, b1_p, w2_p)

    # ---- K2: out = softmax(A @ M + b2) --------------------------------------
    out_pad = pl.pallas_call(
        functools.partial(layer2_softmax_kernel, nclass=nclass),
        out_shape=jax.ShapeDtypeStruct((n_pad, c_pad), jnp.float32),
        grid=grid,
        in_specs=[pl.BlockSpec((tm, n_pad), row_tile),
                  pl.BlockSpec((n_pad, c_pad), whole),
                  pl.BlockSpec((1, c_pad), whole)],
        out_specs=pl.BlockSpec((tm, c_pad), row_tile),
        compiler_params=_compiler_params(
            tiled_bytes=tm * n_pad * 2 + tm * c_pad * 4,
            resident_bytes=n_pad * c_pad * 2 + c_pad * 4),
        cost_estimate=pl.CostEstimate(
            flops=2 * n_pad * n_pad * c_pad + 6 * n_pad * c_pad,
            transcendentals=n_pad * c_pad,
            bytes_accessed=n_pad * n_pad * 2 + n_pad * c_pad * 2
                           + n_pad * c_pad * 4),
    )(a_p, m, b2_p)

    return out_pad[:n, :nclass]


# ------------------------------------------------------------- JAX glue -----

def gcn_norm_dense(edge_index, num_nodes):
    """Dense equivalent of PyG gcn_norm (self loops + symmetric D^-1/2 norm).

    Assumes an undirected / symmetrized edge_index (as in the example below),
    matching GCNConv's default normalization.  Returns A_hat[target, source].
    """
    row, col = edge_index[0], edge_index[1]     # row = source, col = target
    a = jnp.zeros((num_nodes, num_nodes), jnp.float32)
    a = a.at[col, row].add(1.0)                 # A_dense[target, source]
    a = a + jnp.eye(num_nodes, dtype=jnp.float32)
    deg = jnp.sum(a, axis=1)
    dinv = jnp.where(deg > 0, jax.lax.rsqrt(deg), 0.0)
    return dinv[:, None] * a * dinv[None, :]


def init_params(key, nfeat, hdim, nclass):
    k1, k2 = jax.random.split(key)
    lim1 = (6.0 / (nfeat + hdim)) ** 0.5
    lim2 = (6.0 / (hdim + nclass)) ** 0.5
    w1 = jax.random.uniform(k1, (nfeat, hdim), jnp.float32, -lim1, lim1)
    w2 = jax.random.uniform(k2, (hdim, nclass), jnp.float32, -lim2, lim2)
    b1 = jnp.zeros((1, hdim), jnp.float32)
    b2 = jnp.zeros((1, nclass), jnp.float32)
    return w1, b1, w2, b2


if __name__ == "__main__":
    N, NFEAT, HDIM, NCLASS = 16, 8, 64, 4

    key = jax.random.PRNGKey(0)
    kx, kp = jax.random.split(key)

    x = jax.random.normal(kx, (N, NFEAT), jnp.float32)

    # deterministic bidirectional ring graph, edge_index shape [2, 2N]
    src = jnp.arange(N, dtype=jnp.int32)
    dst = (src + 1) % N
    edge_index = jnp.stack([jnp.concatenate([src, dst]),
                            jnp.concatenate([dst, src])], axis=0)

    a_norm = gcn_norm_dense(edge_index, N)
    w1, b1, w2, b2 = init_params(kp, NFEAT, HDIM, NCLASS)

    fwd = jax.jit(gcn_forward)
    out = jax.block_until_ready(fwd(x, a_norm, w1, b1, w2, b2))

    assert out.shape == (N, NCLASS)
    # rows sum to 1 after softmax
    assert bool(jnp.allclose(jnp.sum(out, axis=1), 1.0, atol=1e-4))
    # matches a plain-JAX f32 reference within bf16 tolerance
    h1_ref = a_norm @ (x @ w1) + b1
    h2_ref = a_norm @ (h1_ref @ w2) + b2
    ref = jax.nn.softmax(h2_ref, axis=-1)
    assert bool(jnp.allclose(out, ref, atol=5e-2, rtol=5e-2))

    print("KERNEL_OK")
</pallas_src>

<mosaic_0001>
module attributes {stable_mosaic.version = 11 : i64} {
  func.func @proj_kernel(%arg0: i32, %arg1: memref<16x128xbf16, #tpu.memory_space<vmem>>, %arg2: memref<128x128xbf16, #tpu.memory_space<vmem>>, %arg3: memref<16x128xbf16, #tpu.memory_space<vmem>>) attributes {dimension_semantics = [#tpu.dimension_semantics<parallel>], iteration_bounds = array<i64: 1>, scalar_prefetch = 0 : i64, scratch_operands = 0 : i64, tpu.core_type = #tpu.core_type<tc>, window_params = [{transform_indices = @transform_0, window_bounds = array<i64: 16, 128>}, {pipeline_mode = #tpu.pipeline_mode<synchronous>, transform_indices = @transform_1, window_bounds = array<i64: 128, 128>}, {transform_indices = @transform_2, window_bounds = array<i64: 16, 128>}]} {
    %c0 = arith.constant 0 : index
    %c0_0 = arith.constant 0 : index
    %0 = vector.load %arg1[%c0, %c0_0] : memref<16x128xbf16, #tpu.memory_space<vmem>>, vector<16x128xbf16>
    %c0_1 = arith.constant 0 : index
    %c0_2 = arith.constant 0 : index
    %1 = vector.load %arg2[%c0_1, %c0_2] : memref<128x128xbf16, #tpu.memory_space<vmem>>, vector<128x128xbf16>
    %cst = arith.constant dense<0.000000e+00> : vector<16x128xf32>
    %2 = tpu.matmul %0, %1, %cst {dimension_numbers = #tpu.dot_dimension_numbers<[1], [0], [0], [1], [0, 0, 1, 1], [], []>} : vector<16x128xbf16>, vector<128x128xbf16>, vector<16x128xf32> -> vector<16x128xf32>
    %3 = arith.truncf %2 : vector<16x128xf32> to vector<16x128xbf16>
    %c0_3 = arith.constant 0 : index
    %c0_4 = arith.constant 0 : index
    %4 = vector.load %arg3[%c0_3, %c0_4] : memref<16x128xbf16, #tpu.memory_space<vmem>>, vector<16x128xbf16>
    tpu.vector_store %arg3[%c0_3, %c0_4], %3 {strides = array<i32>} : memref<16x128xbf16, #tpu.memory_space<vmem>>, vector<16x128xbf16>,
    return
  }
  func.func @transform_0(%arg0: i32) -> (i32, i32) {
    %c0_i32 = arith.constant 0 : i32
    %c0_i32_0 = arith.constant 0 : i32
    return %arg0, %c0_i32 : i32, i32
  }
  func.func @transform_1(%arg0: i32) -> (i32, i32) {
    %c0_i32 = arith.constant 0 : i32
    %c0_i32_0 = arith.constant 0 : i32
    %c0_i32_1 = arith.constant 0 : i32
    return %c0_i32, %c0_i32_0 : i32, i32
  }
  func.func @transform_2(%arg0: i32) -> (i32, i32) {
    %c0_i32 = arith.constant 0 : i32
    %c0_i32_0 = arith.constant 0 : i32
    return %arg0, %c0_i32 : i32, i32
  }
}

module attributes {stable_mosaic.version = 11 : i64} {
  func.func @layer1_kernel(%arg0: i32, %arg1: memref<16x16xbf16, #tpu.memory_space<vmem>>, %arg2: memref<16x128xbf16, #tpu.memory_space<vmem>>, %arg3: memref<1x128xf32, #tpu.memory_space<vmem>>, %arg4: memref<128x128xbf16, #tpu.memory_space<vmem>>, %arg5: memref<16x128xbf16, #tpu.memory_space<vmem>>) attributes {dimension_semantics = [#tpu.dimension_semantics<parallel>], iteration_bounds = array<i64: 1>, scalar_prefetch = 0 : i64, scratch_operands = 0 : i64, tpu.core_type = #tpu.core_type<tc>, window_params = [{transform_indices = @transform_0, window_bounds = array<i64: 16, 16>}, {pipeline_mode = #tpu.pipeline_mode<synchronous>, transform_indices = @transform_1, window_bounds = array<i64: 16, 128>}, {pipeline_mode = #tpu.pipeline_mode<synchronous>, transform_indices = @transform_2, window_bounds = array<i64: 1, 128>}, {pipeline_mode = #tpu.pipeline_mode<synchronous>, transform_indices = @transform_3, window_bounds = array<i64: 128, 128>}, {transform_indices = @transform_4, window_bounds = array<i64: 16, 128>}]} {
    %c0 = arith.constant 0 : index
    %c0_0 = arith.constant 0 : index
    %0 = vector.load %arg1[%c0, %c0_0] : memref<16x16xbf16, #tpu.memory_space<vmem>>, vector<16x16xbf16>
    %c0_1 = arith.constant 0 : index
    %c0_2 = arith.constant 0 : index
    %1 = vector.load %arg2[%c0_1, %c0_2] : memref<16x128xbf16, #tpu.memory_space<vmem>>, vector<16x128xbf16>
    %cst = arith.constant dense<0.000000e+00> : vector<16x128xf32>
    %2 = tpu.matmul %0, %1, %cst {dimension_numbers = #tpu.dot_dimension_numbers<[1], [0], [0], [1], [0, 0, 1, 1], [], []>} : vector<16x16xbf16>, vector<16x128xbf16>, vector<16x128xf32> -> vector<16x128xf32>
    %c0_3 = arith.constant 0 : index
    %c0_4 = arith.constant 0 : index
    %3 = vector.load %arg3[%c0_3, %c0_4] : memref<1x128xf32, #tpu.memory_space<vmem>>, vector<1x128xf32>
    %4 = vector.broadcast %3 : vector<1x128xf32> to vector<16x128xf32>
    %5 = arith.addf %2, %4 : vector<16x128xf32>
    %6 = arith.truncf %5 : vector<16x128xf32> to vector<16x128xbf16>
    %c0_5 = arith.constant 0 : index
    %c0_6 = arith.constant 0 : index
    %7 = vector.load %arg4[%c0_5, %c0_6] : memref<128x128xbf16, #tpu.memory_space<vmem>>, vector<128x128xbf16>
    %cst_7 = arith.constant dense<0.000000e+00> : vector<16x128xf32>
    %8 = tpu.matmul %6, %7, %cst_7 {dimension_numbers = #tpu.dot_dimension_numbers<[1], [0], [0], [1], [0, 0, 1, 1], [], []>} : vector<16x128xbf16>, vector<128x128xbf16>, vector<16x128xf32> -> vector<16x128xf32>
    %9 = arith.truncf %8 : vector<16x128xf32> to vector<16x128xbf16>
    %c0_8 = arith.constant 0 : index
    %c0_9 = arith.constant 0 : index
    %10 = vector.load %arg5[%c0_8, %c0_9] : memref<16x128xbf16, #tpu.memory_space<vmem>>, vector<16x128xbf16>
    tpu.vector_store %arg5[%c0_8, %c0_9], %9 {strides = array<i32>} : memref<16x128xbf16, #tpu.memory_space<vmem>>, vector<16x128xbf16>,
    return
  }
  func.func @transform_0(%arg0: i32) -> (i32, i32) {
    %c0_i32 = arith.constant 0 : i32
    %c0_i32_0 = arith.constant 0 : i32
    return %arg0, %c0_i32 : i32, i32
  }
  func.func @transform_1(%arg0: i32) -> (i32, i32) {
    %c0_i32 = arith.constant 0 : i32
    %c0_i32_0 = arith.constant 0 : i32
    %c0_i32_1 = arith.constant 0 : i32
    return %c0_i32, %c0_i32_0 : i32, i32
  }
  func.func @transform_2(%arg0: i32) -> (i32, i32) {
    %c0_i32 = arith.constant 0 : i32
    %c0_i32_0 = arith.constant 0 : i32
    %c0_i32_1 = arith.constant 0 : i32
    return %c0_i32, %c0_i32_0 : i32, i32
  }
  func.func @transform_3(%arg0: i32) -> (i32, i32) {
    %c0_i32 = arith.constant 0 : i32
    %c0_i32_0 = arith.constant 0 : i32
    %c0_i32_1 = arith.constant 0 : i32
    return %c0_i32, %c0_i32_0 : i32, i32
  }
  func.func @transform_4(%arg0: i32) -> (i32, i32) {
    %c0_i32 = arith.constant 0 : i32
    %c0_i32_0 = arith.constant 0 : i32
    return %arg0, %c0_i32 : i32, i32
  }
}

module attributes {stable_mosaic.version = 11 : i64} {
  func.func @layer2_softmax_kernel(%arg0: i32, %arg1: memref<16x16xbf16, #tpu.memory_space<vmem>>, %arg2: memref<16x128xbf16, #tpu.memory_space<vmem>>, %arg3: memref<1x128xf32, #tpu.memory_space<vmem>>, %arg4: memref<16x128xf32, #tpu.memory_space<vmem>>) attributes {dimension_semantics = [#tpu.dimension_semantics<parallel>], iteration_bounds = array<i64: 1>, scalar_prefetch = 0 : i64, scratch_operands = 0 : i64, tpu.core_type = #tpu.core_type<tc>, window_params = [{transform_indices = @transform_0, window_bounds = array<i64: 16, 16>}, {pipeline_mode = #tpu.pipeline_mode<synchronous>, transform_indices = @transform_1, window_bounds = array<i64: 16, 128>}, {pipeline_mode = #tpu.pipeline_mode<synchronous>, transform_indices = @transform_2, window_bounds = array<i64: 1, 128>}, {transform_indices = @transform_3, window_bounds = array<i64: 16, 128>}]} {
    %c0 = arith.constant 0 : index
    %c0_0 = arith.constant 0 : index
    %0 = vector.load %arg1[%c0, %c0_0] : memref<16x16xbf16, #tpu.memory_space<vmem>>, vector<16x16xbf16>
    %c0_1 = arith.constant 0 : index
    %c0_2 = arith.constant 0 : index
    %1 = vector.load %arg2[%c0_1, %c0_2] : memref<16x128xbf16, #tpu.memory_space<vmem>>, vector<16x128xbf16>
    %cst = arith.constant dense<0.000000e+00> : vector<16x128xf32>
    %2 = tpu.matmul %0, %1, %cst {dimension_numbers = #tpu.dot_dimension_numbers<[1], [0], [0], [1], [0, 0, 1, 1], [], []>} : vector<16x16xbf16>, vector<16x128xbf16>, vector<16x128xf32> -> vector<16x128xf32>
    %c0_3 = arith.constant 0 : index
    %c0_4 = arith.constant 0 : index
    %3 = vector.load %arg3[%c0_3, %c0_4] : memref<1x128xf32, #tpu.memory_space<vmem>>, vector<1x128xf32>
    %4 = vector.broadcast %3 : vector<1x128xf32> to vector<16x128xf32>
    %5 = arith.addf %2, %4 : vector<16x128xf32>
    %6 = tpu.iota {dimensions = array<i32: 1>} : vector<16x128xi32>
    %c4_i32 = arith.constant 4 : i32
    %7 = vector.broadcast %c4_i32 : i32 to vector<16x128xi32>
    %8 = arith.cmpi slt, %6, %7 : vector<16x128xi32>
    %cst_5 = arith.constant 0xFF800000 : f32
    %9 = vector.broadcast %cst_5 : f32 to vector<16x128xf32>
    %10 = arith.select %8, %5, %9 : vector<16x128xi1>, vector<16x128xf32>
    %cst_6 = arith.constant dense<0xFF800000> : vector<16xf32>
    %11 = vector.multi_reduction <maximumf>, %10, %cst_6 [1] : vector<16x128xf32> to vector<16xf32>
    %12 = vector.shape_cast %11 : vector<16xf32> to vector<16x1xf32>
    %13 = vector.broadcast %12 : vector<16x1xf32> to vector<16x128xf32>
    %14 = arith.subf %10, %13 : vector<16x128xf32>
    %15 = math.exp %14 : vector<16x128xf32>
    %cst_7 = arith.constant dense<0.000000e+00> : vector<16xf32>
    %16 = vector.multi_reduction <add>, %15, %cst_7 [1] : vector<16x128xf32> to vector<16xf32>
    %17 = vector.shape_cast %16 : vector<16xf32> to vector<16x1xf32>
    %18 = tpu.reciprocal %17 {approx = true} : vector<16x1xf32> -> vector<16x1xf32>
    %19 = arith.mulf %17, %18 : vector<16x1xf32>
    %cst_8 = arith.constant 2.000000e+00 : f32
    %20 = vector.broadcast %cst_8 : f32 to vector<16x1xf32>
    %21 = arith.subf %20, %19 : vector<16x1xf32>
    %22 = arith.mulf %18, %21 : vector<16x1xf32>
    %23 = vector.broadcast %22 : vector<16x1xf32> to vector<16x128xf32>
    %24 = arith.mulf %15, %23 : vector<16x128xf32>
    %c0_9 = arith.constant 0 : index
    %c0_10 = arith.constant 0 : index
    %25 = vector.load %arg4[%c0_9, %c0_10] : memref<16x128xf32, #tpu.memory_space<vmem>>, vector<16x128xf32>
    tpu.vector_store %arg4[%c0_9, %c0_10], %24 {strides = array<i32>} : memref<16x128xf32, #tpu.memory_space<vmem>>, vector<16x128xf32>,
    return
  }
  func.func @transform_0(%arg0: i32) -> (i32, i32) {
    %c0_i32 = arith.constant 0 : i32
    %c0_i32_0 = arith.constant 0 : i32
    return %arg0, %c0_i32 : i32, i32
  }
  func.func @transform_1(%arg0: i32) -> (i32, i32) {
    %c0_i32 = arith.constant 0 : i32
    %c0_i32_0 = arith.constant 0 : i32
    %c0_i32_1 = arith.constant 0 : i32
    return %c0_i32, %c0_i32_0 : i32, i32
  }
  func.func @transform_2(%arg0: i32) -> (i32, i32) {
    %c0_i32 = arith.constant 0 : i32
    %c0_i32_0 = arith.constant 0 : i32
    %c0_i32_1 = arith.constant 0 : i32
    return %c0_i32, %c0_i32_0 : i32, i32
  }
  func.func @transform_3(%arg0: i32) -> (i32, i32) {
    %c0_i32 = arith.constant 0 : i32
    %c0_i32_0 = arith.constant 0 : i32
    return %arg0, %c0_i32 : i32, i32
  }
}

</mosaic_0001>

<bundles_post_ra>
// kernel: gcn_forward.4
= control target key start
LH: loop header
LB: loop body
LE: loop exit
PB: predicated region body
PF: predicated region fallthrough
CT: control target
= control target key end

     0   :  { %v275_v0 = vmov 0.0   ;;  %vm276_vm0 = vmmov 0   ;;  %vm40_vm1 = vcmask 130048   ;;  %s338_s1 = inlined_call_operand.vmem [shape: bf16[16,128], index: 1, kind: input, shape index: {}]   ;;  %s339_s0 = inlined_call_operand.vmem [shape: bf16[16,16], index: 0, kind: input, shape index: {}]   ;;  %s340_s3 = inlined_call_operand.vmem [shape: bf16[128,128], index: 3, kind: input, shape index: {}]   ;;  %s341_s2 = inlined_call_operand.vmem [shape: f32[1,128], index: 2, kind: input, shape index: {}]   ;;  %s342_s4 = inlined_call_operand.vmem [shape: bf16[16,128], index: 4, kind: output, shape index: {}]  }
   0x1   :  { %237 = vmatprep.subr.bf16.mxu0 %v275_v0  ;;  %v265_v1 = vld [vmem:[%s338_s1] sm:$0xff]   ;;  %239 = vmatprep.mubr.msk.bf16.mxu0 %vm276_vm0, %v275_v0  ;;  %v268_v4 = vld [vmem:[%s340_s3 + $0x8] sm:$0xff]   ;;  %v269_v5 = vld [vmem:[%s340_s3 + $0x10] sm:$0xff]  }
   0x2   :  { %v266_v2 = vld [vmem:[%s339_s0] sm:$0xff]   ;;  %243 = vmatprep.subr.bf16.mxu1 %v275_v0  ;;  %259 = vmatprep.mubr.msk.bf16.mxu1 %vm276_vm0, %v275_v0  ;;  %v270_v6 = vld [vmem:[%s340_s3 + $0x18] sm:$0xff]   ;;  %v272_v8 = vld [vmem:[%s340_s3 + $0x28] sm:$0xff]  }
   0x3   :  { %238 = vmatpush3.bf16.msra.mxu0 %v265_v1  ;;  %v267_v3 = vld [vmem:[%s340_s3] sm:$0xff]   ;;  %v273_v9 = vld [vmem:[%s340_s3 + $0x30] sm:$0xff]   ;;  %v274_v10 = vld [vmem:[%s340_s3 + $0x38] sm:$0xff]  }
   0x4   :  { %244 = vmatpush3.bf16.msra.mxu1 %v267_v3  ;;  %v271_v7 = vld [vmem:[%s340_s3 + $0x20] sm:$0xff]  }
   0x5   :  { %245 = vmatprep.subr.bf16.mxu1 %v275_v0  ;;  %v205_v11 = vld [vmem:[%s341_s2] ss:$0 sm:$0xff] }
   0x6   :  { %240 = vmatmul.mubr.msk.bf16.vlgmr.msra.gmra.mrb[0].mxu0 %vm40_vm1, %v266_v2 }
   0x8   :  { %246 = vmatpush3.bf16.msra.mxu1 %v268_v4 }
   0x9   :  { %247 = vmatprep.subr.bf16.mxu1 %v275_v0 }
   0xc   :  { %248 = vmatpush3.bf16.msra.mxu1 %v269_v5 }
   0xd   :  { %249 = vmatprep.subr.bf16.mxu1 %v275_v0 }
  0x10   :  { %250 = vmatpush3.bf16.msra.mxu1 %v270_v6 }
  0x11   :  { %251 = vmatprep.subr.bf16.mxu1 %v275_v0 }
  0x14   :  { %252 = vmatpush3.bf16.msra.mxu1 %v271_v7 }
  0x15   :  { %253 = vmatprep.subr.bf16.mxu1 %v275_v0 }
  0x18   :  { %254 = vmatpush3.bf16.msra.mxu1 %v272_v8 }
  0x19   :  { %255 = vmatprep.subr.bf16.mxu1 %v275_v0 }
  0x1c   :  { %256 = vmatpush3.bf16.msra.mxu1 %v273_v9 }
  0x1d   :  { %257 = vmatprep.subr.bf16.mxu1 %v275_v0 }
  0x20   :  { %258 = vmatpush3.bf16.msra.mxu1 %v274_v10 }
  0xd9   :  { %v78_v12 = vpop.f32.mrb[0].mxu0 }
  0xda   :  { %v241_v13 = vpop.f32.mrb[1].mxu0  ;;  %v79_v15 = vadd.f32 %v205_v11, %v78_v12 }
  0xdb   :  { %v81_v14 = vpop.f32.mrb[2].mxu0 }
  0xdc   :  { %v82_v16 = vadd.f32 %v205_v11, %v81_v14  ;;  %v242_v17 = vpop.f32.mrb[3].mxu0 }
  0xde   :  { %v85_v18 = vpack.c.bf16 %v82_v16, %v79_v15 }
  0xe0   :  { %260 = vmatmul.mubr.bf16.vlgmr.msra.gmra.mrb[0].mxu1 %v85_v18 }
 0x1b3   :  { %v184_v19 = vpop.f32.mrb[0].mxu1 }
 0x1b4   :  { %v261_v20 = vpop.f32.mrb[1].mxu1 }
 0x1b5   :  { %v187_v21 = vpop.f32.mrb[2].mxu1 }
 0x1b6   :  { %v224_v22 = vpack.c.bf16 %v187_v21, %v184_v19  ;;  %v262_v23 = vpop.f32.mrb[3].mxu1 }
 0x1b8   :  { %225 = vst [vmem:[%s342_s4] sm:$0xff] %v224_v22  }

// kernel: gcn_forward.5
= control target key start
LH: loop header
LB: loop body
LE: loop exit
PB: predicated region body
PF: predicated region fallthrough
CT: control target
= control target key end

     0   :  { %v141_v0 = vmov 0.0   ;;  %vm142_vm0 = vmmov 0   ;;  %vm37_vm1 = vcmask 130048   ;;  %v82_v3 = vlaneseq  ;;  %s178_s1 = inlined_call_operand.vmem [shape: bf16[16,128], index: 1, kind: input, shape index: {}]   ;;  %s179_s0 = inlined_call_operand.vmem [shape: bf16[16,16], index: 0, kind: input, shape index: {}]   ;;  %s180_s2 = inlined_call_operand.vmem [shape: f32[1,128], index: 2, kind: input, shape index: {}]   ;;  %s181_s3 = inlined_call_operand.vmem [shape: f32[16,128], index: 3, kind: output, shape index: {}]  }
   0x1   :  { %123 = vmatprep.subr.bf16.mxu0 %v141_v0  ;;  %v131_v1 = vld [vmem:[%s178_s1] sm:$0xff]   ;;  %125 = vmatprep.mubr.msk.bf16.mxu0 %vm142_vm0, %v141_v0 }
   0x2   :  { %v132_v2 = vld [vmem:[%s179_s0] sm:$0xff]   ;;  %124 = vmatpush3.bf16.msra.mxu0 %v131_v1  ;;  %v83_v4 = vand.u32 127, %v82_v3 }
   0x3   :  { %v117_v5 = vld [vmem:[%s180_s2] ss:$0 sm:$0xff] }
   0x4   :  { %vm84_vm2 = vcmp.lt.s32.totalorder %v83_v4, 4 }
   0x5   :  { %126 = vmatmul.mubr.msk.bf16.vlgmr.msra.gmra.mrb[0].mxu0 %vm37_vm1, %v132_v2 }
  0xd8   :  { %v75_v6 = vpop.f32.mrb[0].mxu0 }
  0xd9   :  { %v76_v7 = vadd.f32 %v117_v5, %v75_v6  ;;  %v127_v8 = vpop.f32.mrb[1].mxu0 }
  0xda   :  { %v78_v9 = vpop.f32.mrb[2].mxu0 }
  0xdb   :  { %v79_v10 = vadd.f32 %v117_v5, %v78_v9  ;;  %v128_v11 = vpop.f32.mrb[3].mxu0  ;;  %v85_v12 = vsel %vm84_vm2, %v76_v7, -inf }
  0xdc   :  { %87 = vmax.xlane.f32.xlu0 %v85_v12 }
  0xdd   :  { %v86_v13 = vsel %vm84_vm2, %v79_v10, -inf }
  0xe0   :  { %89 = vmax.xlane.f32.xlu0 %v86_v13 }
 0x169   :  { %v88_v14 = vpop.xlane.xlu0 %87 }
 0x16a   :  { %v91_v15 = vsub.f32 %v85_v12, %v88_v14 }
 0x16c   :  { %v93_v16 = vmul.f32 1.442695, %v91_v15 }
 0x16d   :  { %v90_v17 = vpop.xlane.xlu0 %89 }
 0x16e   :  { %133 = vpow2.f32 %v93_v16  ;;  %v92_v18 = vsub.f32 %v86_v13, %v90_v17 }
 0x170   :  { %v95_v19 = vmul.f32 1.442695, %v92_v18 }
 0x172   :  { %135 = vpow2.f32 %v95_v19 }
 0x178   :  { %v134_v20 = vpop.eup %133 }
 0x179   :  { %97 = vadd.xlane.f32.xlu1 %v134_v20 }
 0x17c   :  { %v136_v21 = vpop.eup %135 }
 0x17d   :  { %99 = vadd.xlane.f32.xlu1 %v136_v21 }
 0x206   :  { %v98_v22 = vpop.xlane.xlu1 %97 }
 0x207   :  { %137 = vrcp.f32 %v98_v22 }
 0x20a   :  { %v100_v23 = vpop.xlane.xlu1 %99 }
 0x20b   :  { %139 = vrcp.f32 %v100_v23 }
 0x211   :  { %v138_v24 = vpop.eup %137 }
 0x212   :  { %v103_v25 = vmul.f32 %v138_v24, %v98_v22 }
 0x214   :  { %v105_v26 = vsub.f32 2.0, %v103_v25 }
 0x215   :  { %v140_v27 = vpop.eup %139 }
 0x216   :  { %v107_v28 = vmul.f32 %v138_v24, %v105_v26  ;;  %v104_v29 = vmul.f32 %v140_v27, %v100_v23 }
 0x218   :  { %v109_v30 = vmul.f32 %v134_v20, %v107_v28  ;;  %v106_v31 = vsub.f32 2.0, %v104_v29 }
 0x21a   :  { %111 = vst [vmem:[%s181_s3] sm:$0xff] %v109_v30  ;;  %v108_v32 = vmul.f32 %v140_v27, %v106_v31 }
 0x21c   :  { %v110_v33 = vmul.f32 %v136_v21, %v108_v32 }
 0x21e   :  { %112 = vst [vmem:[%s181_s3 + $0x8] sm:$0xff] %v110_v33 }

// kernel: gcn_forward.3
= control target key start
LH: loop header
LB: loop body
LE: loop exit
PB: predicated region body
PF: predicated region fallthrough
CT: control target
= control target key end

     0   :  { %v197_v0 = vmov 0.0   ;;  %vm198_vm0 = vmmov 0   ;;  %s244_s1 = inlined_call_operand.vmem [shape: bf16[128,128], index: 1, kind: input, shape index: {}]   ;;  %s245_s0 = inlined_call_operand.vmem [shape: bf16[16,128], index: 0, kind: input, shape index: {}]   ;;  %s246_s2 = inlined_call_operand.vmem [shape: bf16[16,128], index: 2, kind: output, shape index: {}]  }
   0x1   :  { %166 = vmatprep.subr.bf16.mxu0 %v197_v0  ;;  %v188_v1 = vld [vmem:[%s244_s1] sm:$0xff]   ;;  %182 = vmatprep.mubr.msk.bf16.mxu0 %vm198_vm0, %v197_v0  ;;  %v189_v2 = vld [vmem:[%s244_s1 + $0x8] sm:$0xff]   ;;  %v190_v3 = vld [vmem:[%s244_s1 + $0x10] sm:$0xff]  }
   0x2   :  { %167 = vmatpush3.bf16.msra.mxu0 %v188_v1  ;;  %v191_v4 = vld [vmem:[%s244_s1 + $0x18] sm:$0xff]   ;;  %v192_v5 = vld [vmem:[%s244_s1 + $0x20] sm:$0xff]   ;;  %v193_v6 = vld [vmem:[%s244_s1 + $0x28] sm:$0xff]  }
   0x3   :  { %168 = vmatprep.subr.bf16.mxu0 %v197_v0  ;;  %v194_v7 = vld [vmem:[%s244_s1 + $0x30] sm:$0xff]   ;;  %v195_v8 = vld [vmem:[%s244_s1 + $0x38] sm:$0xff]   ;;  %v196_v9 = vld [vmem:[%s245_s0] sm:$0xff]  }
   0x6   :  { %169 = vmatpush3.bf16.msra.mxu0 %v189_v2 }
   0x7   :  { %170 = vmatprep.subr.bf16.mxu0 %v197_v0 }
   0xa   :  { %171 = vmatpush3.bf16.msra.mxu0 %v190_v3 }
   0xb   :  { %172 = vmatprep.subr.bf16.mxu0 %v197_v0 }
   0xe   :  { %173 = vmatpush3.bf16.msra.mxu0 %v191_v4 }
   0xf   :  { %174 = vmatprep.subr.bf16.mxu0 %v197_v0 }
  0x12   :  { %175 = vmatpush3.bf16.msra.mxu0 %v192_v5 }
  0x13   :  { %176 = vmatprep.subr.bf16.mxu0 %v197_v0 }
  0x16   :  { %177 = vmatpush3.bf16.msra.mxu0 %v193_v6 }
  0x17   :  { %178 = vmatprep.subr.bf16.mxu0 %v197_v0 }
  0x1a   :  { %179 = vmatpush3.bf16.msra.mxu0 %v194_v7 }
  0x1b   :  { %180 = vmatprep.subr.bf16.mxu0 %v197_v0 }
  0x1e   :  { %181 = vmatpush3.bf16.msra.mxu0 %v195_v8 }
  0x21   :  { %183 = vmatmul.mubr.bf16.vlgmr.msra.gmra.mrb[0].mxu0 %v196_v9 }
  0xf4   :  { %v118_v10 = vpop.f32.mrb[0].mxu0 }
  0xf5   :  { %v184_v11 = vpop.f32.mrb[1].mxu0 }
  0xf6   :  { %v121_v12 = vpop.f32.mrb[2].mxu0 }
  0xf7   :  { %v155_v13 = vpack.c.bf16 %v121_v12, %v118_v10  ;;  %v185_v14 = vpop.f32.mrb[3].mxu0 }
  0xf9   :  { %156 = vst [vmem:[%s246_s2] sm:$0xff] %v155_v13  }

</bundles_post_ra>
